<compile_context>
chip_gen: v5e
topology: v5e:2x2
jax: 0.10.0
libtpu: 0.0.40
codegen_flags: <defaults>
</compile_context>

<pallas_src>
import math

import jax
import jax.numpy as jnp
from jax import lax
from jax.experimental import pallas as pl
from jax.experimental.pallas import tpu as pltpu

EXPANSION = 2          # BottleNeck.expansion
_BN_EPS = 1e-5
_LANE = 128


def _round_up(x, m):
    return ((x + m - 1) // m) * m


def _fold_params(params):
    """Fold BN scale into conv weights (exact: convs have no bias), bf16-cast.

    Returns (w1, b1), (w2, b2), (w3, b3) with
      w1: (Cin, C)  bf16     b1: (C,)  f32
      w2: (3, C, C) bf16     b2: (C,)  f32
      w3: (C, 2C)   bf16     b3: (2C,) f32
    Shared by the kernel wrapper and the plain-JAX reference so both use
    bit-identical folded weights.
    """
    s1, b1 = params["bn1"]
    s2, b2 = params["bn2"]
    s3, b3 = params["bn3"]
    w1 = (params["w1"][0] * s1).astype(jnp.bfloat16)
    w2 = (params["w2"] * s2).astype(jnp.bfloat16)
    w3 = (params["w3"][0] * s3).astype(jnp.bfloat16)
    return ((w1, b1.astype(jnp.float32)),
            (w2, b2.astype(jnp.float32)),
            (w3, b3.astype(jnp.float32)))


# ---------------------------------------------------------------------------
# Fully fused BottleNeck kernel
#   conv1(1x1) -> bn1 -> relu -> conv2(3,p=1) -> bn2 -> relu
#   -> conv3(1x1) -> bn3 -> relu -> + residual -> relu
# ---------------------------------------------------------------------------
def _bottleneck_kernel(x_ref, w1_ref, b1_ref, w2_ref, b2_ref, w3_ref, b3_ref,
                       o_ref):
    x = x_ref[0]                                       # (L, Cin_p) f32, read once
    l = x.shape[0]

    # ---- conv1 (1x1) + folded BN + ReLU ------------------------------------
    h1 = jnp.dot(x.astype(jnp.bfloat16), w1_ref[...],
                 preferred_element_type=jnp.float32)
    h1 = jnp.maximum(h1 + b1_ref[...], 0.0)            # (L, C_p) f32

    # ---- conv2 (k=3, padding=1): im2col in VMEM, one 3*C_p-deep GEMM -------
    # Shift the bf16-able conv1 output on the sublane axis (XLU roll, cheap)
    # and zero the spatial-padding rows with an iota mask; then concatenate
    # the three taps on the lane axis so the MXU sees a single deep matmul.
    row = lax.broadcasted_iota(jnp.int32, h1.shape, 0)
    prev = jnp.where(row >= 1, pltpu.roll(h1, shift=1, axis=0), 0.0)       # h1[i-1]
    nxt = jnp.where(row <= l - 2, pltpu.roll(h1, shift=l - 1, axis=0), 0.0)  # h1[i+1]
    cols = jnp.concatenate(
        [prev.astype(jnp.bfloat16),
         h1.astype(jnp.bfloat16),
         nxt.astype(jnp.bfloat16)], axis=-1)           # (L, 3*C_p)
    h2 = jnp.dot(cols, w2_ref[...], preferred_element_type=jnp.float32)
    h2 = jnp.maximum(h2 + b2_ref[...], 0.0)            # (L, C_p) f32

    # ---- conv3 (1x1) + folded BN + ReLU, residual add, final ReLU ----------
    h3 = jnp.dot(h2.astype(jnp.bfloat16), w3_ref[...],
                 preferred_element_type=jnp.float32)
    h3 = jnp.maximum(h3 + b3_ref[...], 0.0)            # module relu's bn3 output
    y = jnp.maximum(h3 + x, 0.0)                       # identity residual + ReLU
    o_ref[0] = y.astype(o_ref.dtype)                   # lane-dense store


# ---------------------------------------------------------------------------
# Wrapper (PyTorch NCL layout at the boundary)
# ---------------------------------------------------------------------------
def bottleneck_forward(params, x_ncl, stride=1):
    n, cin, l = x_ncl.shape
    _, c_mid, _ = params["w2"].shape
    cout = params["w3"].shape[-1]

    # TODO(synk): external `downsample` / stride != 1 residual not modeled;
    # identity residual requires stride == 1 and in_channel == channel*expansion.
    assert stride == 1 and cin == cout, "identity residual requires matching shapes"

    cin_p = _round_up(cin, _LANE)
    c_p = _round_up(c_mid, _LANE)
    cout_p = _round_up(cout, _LANE)
    assert cin_p == cout_p

    # Single NCL -> NLC pass; pad channels to lane-dense multiples of 128
    # (no-op when already aligned).  x stays f32: it is both the bf16 conv1
    # operand (cast in-kernel) and the f32 residual, read from HBM once.
    x = jnp.transpose(x_ncl, (0, 2, 1)).astype(jnp.float32)
    x = jnp.pad(x, ((0, 0), (0, 0), (0, cin_p - cin)))

    (w1, b1), (w2, b2), (w3, b3) = _fold_params(params)
    w1p = jnp.pad(w1, ((0, cin_p - cin), (0, c_p - c_mid)))
    # conv2 taps stacked on the contraction axis -> (3*C_p, C_p) matmul operand.
    w2p = jnp.pad(w2, ((0, 0), (0, c_p - c_mid), (0, c_p - c_mid)))
    w2p = w2p.reshape(3 * c_p, c_p)
    w3p = jnp.pad(w3, ((0, c_p - c_mid), (0, cout_p - cout)))
    b1p = jnp.pad(b1, (0, c_p - c_mid)).reshape(1, c_p)
    b2p = jnp.pad(b2, (0, c_p - c_mid)).reshape(1, c_p)
    b3p = jnp.pad(b3, (0, cout_p - cout)).reshape(1, cout_p)

    out = pl.pallas_call(
        _bottleneck_kernel,
        out_shape=jax.ShapeDtypeStruct((n, l, cout_p), jnp.float32),
        grid=(n,),
        in_specs=[
            pl.BlockSpec((1, l, cin_p), lambda b: (b, 0, 0)),      # x (f32)
            pl.BlockSpec((cin_p, c_p), lambda b: (0, 0)),          # w1 (bf16)
            pl.BlockSpec((1, c_p), lambda b: (0, 0)),              # b1 (f32)
            pl.BlockSpec((3 * c_p, c_p), lambda b: (0, 0)),        # w2 (bf16)
            pl.BlockSpec((1, c_p), lambda b: (0, 0)),              # b2 (f32)
            pl.BlockSpec((c_p, cout_p), lambda b: (0, 0)),         # w3 (bf16)
            pl.BlockSpec((1, cout_p), lambda b: (0, 0)),           # b3 (f32)
        ],
        out_specs=pl.BlockSpec((1, l, cout_p), lambda b: (b, 0, 0)),
        compiler_params=pltpu.CompilerParams(
            dimension_semantics=("parallel",)),
    )(x, w1p, b1p, w2p, b2p, w3p, b3p)

    out = out[:, :, :cout]                                         # trim lane pad
    return jnp.transpose(out, (0, 2, 1))                           # NLC -> NCL


# ---------------------------------------------------------------------------
# Deterministic synthetic parameters (shapes from the module's __init__)
# ---------------------------------------------------------------------------
def init_conv(key, ks, cin, cout):
    fan_in = ks * cin
    return jax.random.normal(key, (ks, cin, cout), jnp.float32) / math.sqrt(fan_in)


def init_bn(key, c):
    k1, k2, k3, k4 = jax.random.split(key, 4)
    gamma = 1.0 + 0.1 * jax.random.normal(k1, (c,), jnp.float32)
    beta = 0.1 * jax.random.normal(k2, (c,), jnp.float32)
    mean = 0.1 * jax.random.normal(k3, (c,), jnp.float32)
    var = 0.5 + jax.random.uniform(k4, (c,), jnp.float32)
    scale = gamma / jnp.sqrt(var + _BN_EPS)
    bias = beta - mean * scale
    return scale, bias


def init_bottleneck(key, in_channel, channel):
    keys = jax.random.split(key, 6)
    return {
        "w1": init_conv(keys[0], 1, in_channel, channel),
        "bn1": init_bn(keys[1], channel),
        "w2": init_conv(keys[2], 3, channel, channel),
        "bn2": init_bn(keys[3], channel),
        "w3": init_conv(keys[4], 1, channel, channel * EXPANSION),
        "bn3": init_bn(keys[5], channel * EXPANSION),
    }


# ---------------------------------------------------------------------------
# Plain-JAX reference (mirrors the kernel's folded-bf16 / f32-accumulate math)
# ---------------------------------------------------------------------------
def _mm_ref(a_f32, w_bf16):
    return jnp.einsum("...c,cd->...d",
                      a_f32.astype(jnp.bfloat16).astype(jnp.float32),
                      w_bf16.astype(jnp.float32),
                      precision=lax.Precision.HIGHEST)


def bottleneck_reference(params, x_ncl, stride=1):
    assert stride == 1
    (w1, b1), (w2, b2), (w3, b3) = _fold_params(params)
    x = jnp.transpose(x_ncl, (0, 2, 1)).astype(jnp.float32)        # NCL -> NLC

    h1 = jnp.maximum(_mm_ref(x, w1) + b1, 0.0)
    z = jnp.zeros_like(h1[:, :1, :])
    prev = jnp.concatenate([z, h1[:, :-1, :]], axis=1)
    nxt = jnp.concatenate([h1[:, 1:, :], z], axis=1)
    cols = jnp.concatenate([prev, h1, nxt], axis=-1)
    w2m = w2.reshape(3 * w2.shape[1], w2.shape[2])
    h2 = jnp.maximum(_mm_ref(cols, w2m) + b2, 0.0)
    h3 = jnp.maximum(_mm_ref(h2, w3) + b3, 0.0)
    y = jnp.maximum(h3 + x, 0.0)                                   # residual + ReLU
    return jnp.transpose(y, (0, 2, 1))                             # NLC -> NCL


if __name__ == "__main__":
    key = jax.random.PRNGKey(0)
    pkey, xkey = jax.random.split(key)

    n, l = 2, 128
    in_channel, channel, stride = 128, 64, 1        # expansion=2 -> out = 128 = in
    params = init_bottleneck(pkey, in_channel, channel)
    x = jax.random.normal(xkey, (n, in_channel, l), jnp.float32)   # NCL like PyTorch

    out = jax.block_until_ready(bottleneck_forward(params, x, stride=stride))
    ref = bottleneck_reference(params, x, stride=stride)

    assert out.shape == (n, channel * EXPANSION, l)
    assert bool(jnp.all(jnp.isfinite(out)))
    max_err = float(jnp.max(jnp.abs(out - ref)))
    assert bool(jnp.allclose(out, ref, atol=2e-2, rtol=2e-2)), max_err
    print("KERNEL_OK")
</pallas_src>

<mosaic_0001>
module attributes {stable_mosaic.version = 11 : i64} {
  func.func @_bottleneck_kernel(%arg0: i32, %arg1: memref<1x128x128xf32, #tpu.memory_space<vmem>>, %arg2: memref<128x128xbf16, #tpu.memory_space<vmem>>, %arg3: memref<1x128xf32, #tpu.memory_space<vmem>>, %arg4: memref<384x128xbf16, #tpu.memory_space<vmem>>, %arg5: memref<1x128xf32, #tpu.memory_space<vmem>>, %arg6: memref<128x128xbf16, #tpu.memory_space<vmem>>, %arg7: memref<1x128xf32, #tpu.memory_space<vmem>>, %arg8: memref<1x128x128xf32, #tpu.memory_space<vmem>>) attributes {dimension_semantics = [#tpu.dimension_semantics<parallel>], iteration_bounds = array<i64: 2>, scalar_prefetch = 0 : i64, scratch_operands = 0 : i64, tpu.core_type = #tpu.core_type<tc>, window_params = [{transform_indices = @transform_0, window_bounds = array<i64: 1, 128, 128>}, {pipeline_mode = #tpu.pipeline_mode<synchronous>, transform_indices = @transform_1, window_bounds = array<i64: 128, 128>}, {pipeline_mode = #tpu.pipeline_mode<synchronous>, transform_indices = @transform_2, window_bounds = array<i64: 1, 128>}, {pipeline_mode = #tpu.pipeline_mode<synchronous>, transform_indices = @transform_3, window_bounds = array<i64: 384, 128>}, {pipeline_mode = #tpu.pipeline_mode<synchronous>, transform_indices = @transform_4, window_bounds = array<i64: 1, 128>}, {pipeline_mode = #tpu.pipeline_mode<synchronous>, transform_indices = @transform_5, window_bounds = array<i64: 128, 128>}, {pipeline_mode = #tpu.pipeline_mode<synchronous>, transform_indices = @transform_6, window_bounds = array<i64: 1, 128>}, {transform_indices = @transform_7, window_bounds = array<i64: 1, 128, 128>}]} {
    %c0 = arith.constant 0 : index
    %c0_0 = arith.constant 0 : index
    %c0_1 = arith.constant 0 : index
    %0 = vector.load %arg1[%c0, %c0_0, %c0_1] : memref<1x128x128xf32, #tpu.memory_space<vmem>>, vector<1x128x128xf32>
    %1 = vector.shape_cast %0 : vector<1x128x128xf32> to vector<128x128xf32>
    %2 = arith.truncf %1 : vector<128x128xf32> to vector<128x128xbf16>
    %c0_2 = arith.constant 0 : index
    %c0_3 = arith.constant 0 : index
    %3 = vector.load %arg2[%c0_2, %c0_3] : memref<128x128xbf16, #tpu.memory_space<vmem>>, vector<128x128xbf16>
    %cst = arith.constant dense<0.000000e+00> : vector<128x128xf32>
    %4 = tpu.matmul %2, %3, %cst {dimension_numbers = #tpu.dot_dimension_numbers<[1], [0], [0], [1], [0, 0, 1, 1], [], []>} : vector<128x128xbf16>, vector<128x128xbf16>, vector<128x128xf32> -> vector<128x128xf32>
    %c0_4 = arith.constant 0 : index
    %c0_5 = arith.constant 0 : index
    %5 = vector.load %arg3[%c0_4, %c0_5] : memref<1x128xf32, #tpu.memory_space<vmem>>, vector<1x128xf32>
    %6 = vector.broadcast %5 : vector<1x128xf32> to vector<128x128xf32>
    %7 = arith.addf %4, %6 : vector<128x128xf32>
    %cst_6 = arith.constant 0.000000e+00 : f32
    %8 = vector.broadcast %cst_6 : f32 to vector<128x128xf32>
    %9 = arith.maximumf %7, %8 : vector<128x128xf32>
    %10 = tpu.iota {dimensions = array<i32: 0>} : vector<128x128xi32>
    %c1_i32 = arith.constant 1 : i32
    %11 = vector.broadcast %c1_i32 : i32 to vector<128x128xi32>
    %12 = arith.cmpi sge, %10, %11 : vector<128x128xi32>
    %c1_i32_7 = arith.constant 1 : i32
    %13 = tpu.dynamic_rotate %9 by %c1_i32_7 dim 0 : vector<128x128xf32>, i32 -> vector<128x128xf32>
    %cst_8 = arith.constant 0.000000e+00 : f32
    %14 = vector.broadcast %cst_8 : f32 to vector<128x128xf32>
    %15 = arith.select %12, %13, %14 : vector<128x128xi1>, vector<128x128xf32>
    %c126_i32 = arith.constant 126 : i32
    %16 = vector.broadcast %c126_i32 : i32 to vector<128x128xi32>
    %17 = arith.cmpi sle, %10, %16 : vector<128x128xi32>
    %c127_i32 = arith.constant 127 : i32
    %18 = tpu.dynamic_rotate %9 by %c127_i32 dim 0 : vector<128x128xf32>, i32 -> vector<128x128xf32>
    %cst_9 = arith.constant 0.000000e+00 : f32
    %19 = vector.broadcast %cst_9 : f32 to vector<128x128xf32>
    %20 = arith.select %17, %18, %19 : vector<128x128xi1>, vector<128x128xf32>
    %21 = arith.truncf %15 : vector<128x128xf32> to vector<128x128xbf16>
    %22 = arith.truncf %9 : vector<128x128xf32> to vector<128x128xbf16>
    %23 = arith.truncf %20 : vector<128x128xf32> to vector<128x128xbf16>
    %24 = tpu.concatenate %21, %22, %23 in 1 : vector<128x128xbf16>, vector<128x128xbf16>, vector<128x128xbf16> -> vector<128x384xbf16>
    %c0_10 = arith.constant 0 : index
    %c0_11 = arith.constant 0 : index
    %25 = vector.load %arg4[%c0_10, %c0_11] : memref<384x128xbf16, #tpu.memory_space<vmem>>, vector<384x128xbf16>
    %cst_12 = arith.constant dense<0.000000e+00> : vector<128x128xf32>
    %26 = tpu.matmul %24, %25, %cst_12 {dimension_numbers = #tpu.dot_dimension_numbers<[1], [0], [0], [1], [0, 0, 1, 1], [], []>} : vector<128x384xbf16>, vector<384x128xbf16>, vector<128x128xf32> -> vector<128x128xf32>
    %c0_13 = arith.constant 0 : index
    %c0_14 = arith.constant 0 : index
    %27 = vector.load %arg5[%c0_13, %c0_14] : memref<1x128xf32, #tpu.memory_space<vmem>>, vector<1x128xf32>
    %28 = vector.broadcast %27 : vector<1x128xf32> to vector<128x128xf32>
    %29 = arith.addf %26, %28 : vector<128x128xf32>
    %cst_15 = arith.constant 0.000000e+00 : f32
    %30 = vector.broadcast %cst_15 : f32 to vector<128x128xf32>
    %31 = arith.maximumf %29, %30 : vector<128x128xf32>
    %32 = arith.truncf %31 : vector<128x128xf32> to vector<128x128xbf16>
    %c0_16 = arith.constant 0 : index
    %c0_17 = arith.constant 0 : index
    %33 = vector.load %arg6[%c0_16, %c0_17] : memref<128x128xbf16, #tpu.memory_space<vmem>>, vector<128x128xbf16>
    %cst_18 = arith.constant dense<0.000000e+00> : vector<128x128xf32>
    %34 = tpu.matmul %32, %33, %cst_18 {dimension_numbers = #tpu.dot_dimension_numbers<[1], [0], [0], [1], [0, 0, 1, 1], [], []>} : vector<128x128xbf16>, vector<128x128xbf16>, vector<128x128xf32> -> vector<128x128xf32>
    %c0_19 = arith.constant 0 : index
    %c0_20 = arith.constant 0 : index
    %35 = vector.load %arg7[%c0_19, %c0_20] : memref<1x128xf32, #tpu.memory_space<vmem>>, vector<1x128xf32>
    %36 = vector.broadcast %35 : vector<1x128xf32> to vector<128x128xf32>
    %37 = arith.addf %34, %36 : vector<128x128xf32>
    %cst_21 = arith.constant 0.000000e+00 : f32
    %38 = vector.broadcast %cst_21 : f32 to vector<128x128xf32>
    %39 = arith.maximumf %37, %38 : vector<128x128xf32>
    %40 = arith.addf %39, %1 : vector<128x128xf32>
    %cst_22 = arith.constant 0.000000e+00 : f32
    %41 = vector.broadcast %cst_22 : f32 to vector<128x128xf32>
    %42 = arith.maximumf %40, %41 : vector<128x128xf32>
    %c0_23 = arith.constant 0 : index
    %c0_24 = arith.constant 0 : index
    %c0_25 = arith.constant 0 : index
    %43 = vector.load %arg8[%c0_23, %c0_24, %c0_25] : memref<1x128x128xf32, #tpu.memory_space<vmem>>, vector<1x128x128xf32>
    %44 = vector.shape_cast %43 : vector<1x128x128xf32> to vector<128x128xf32>
    %45 = vector.shape_cast %42 : vector<128x128xf32> to vector<1x128x128xf32>
    tpu.vector_store %arg8[%c0_23, %c0_24, %c0_25], %45 {strides = array<i32>} : memref<1x128x128xf32, #tpu.memory_space<vmem>>, vector<1x128x128xf32>,
    return
  }
  func.func @transform_0(%arg0: i32) -> (i32, i32, i32) {
    %c0_i32 = arith.constant 0 : i32
    %c0_i32_0 = arith.constant 0 : i32
    %c0_i32_1 = arith.constant 0 : i32
    return %arg0, %c0_i32, %c0_i32_0 : i32, i32, i32
  }
  func.func @transform_1(%arg0: i32) -> (i32, i32) {
    %c0_i32 = arith.constant 0 : i32
    %c0_i32_0 = arith.constant 0 : i32
    %c0_i32_1 = arith.constant 0 : i32
    return %c0_i32, %c0_i32_0 : i32, i32
  }
  func.func @transform_2(%arg0: i32) -> (i32, i32) {
    %c0_i32 = arith.constant 0 : i32
    %c0_i32_0 = arith.constant 0 : i32
    %c0_i32_1 = arith.constant 0 : i32
    return %c0_i32, %c0_i32_0 : i32, i32
  }
  func.func @transform_3(%arg0: i32) -> (i32, i32) {
    %c0_i32 = arith.constant 0 : i32
    %c0_i32_0 = arith.constant 0 : i32
    %c0_i32_1 = arith.constant 0 : i32
    return %c0_i32, %c0_i32_0 : i32, i32
  }
  func.func @transform_4(%arg0: i32) -> (i32, i32) {
    %c0_i32 = arith.constant 0 : i32
    %c0_i32_0 = arith.constant 0 : i32
    %c0_i32_1 = arith.constant 0 : i32
    return %c0_i32, %c0_i32_0 : i32, i32
  }
  func.func @transform_5(%arg0: i32) -> (i32, i32) {
    %c0_i32 = arith.constant 0 : i32
    %c0_i32_0 = arith.constant 0 : i32
    %c0_i32_1 = arith.constant 0 : i32
    return %c0_i32, %c0_i32_0 : i32, i32
  }
  func.func @transform_6(%arg0: i32) -> (i32, i32) {
    %c0_i32 = arith.constant 0 : i32
    %c0_i32_0 = arith.constant 0 : i32
    %c0_i32_1 = arith.constant 0 : i32
    return %c0_i32, %c0_i32_0 : i32, i32
  }
  func.func @transform_7(%arg0: i32) -> (i32, i32, i32) {
    %c0_i32 = arith.constant 0 : i32
    %c0_i32_0 = arith.constant 0 : i32
    %c0_i32_1 = arith.constant 0 : i32
    return %arg0, %c0_i32, %c0_i32_0 : i32, i32, i32
  }
}

</mosaic_0001>

<bundles_post_ra>
// kernel: tpu_custom_call.1
= control target key start
LH: loop header
LB: loop body
LE: loop exit
PB: predicated region body
PF: predicated region fallthrough
CT: control target
= control target key end

     0   :  { %s2688_s0 = inlined_call_operand.hbm [shape: f32[2,128,128], index: 0, kind: input, shape index: {}]   ;;  %s2689_s1 = inlined_call_operand.hbm [shape: bf16[128,128], index: 1, kind: input, shape index: {}]   ;;  %s2690_s2 = inlined_call_operand.vmem [shape: f32[1,128], index: 2, kind: input, shape index: {}]   ;;  %s2691_s3 = inlined_call_operand.hbm [shape: bf16[384,128], index: 3, kind: input, shape index: {}]   ;;  %s2692_s4 = inlined_call_operand.vmem [shape: f32[1,128], index: 4, kind: input, shape index: {}]   ;;  %s2693_s5 = inlined_call_operand.hbm [shape: bf16[128,128], index: 5, kind: input, shape index: {}]   ;;  %s2694_s6 = inlined_call_operand.vmem [shape: f32[1,128], index: 6, kind: input, shape index: {}]   ;;  %s2695_s7 = inlined_call_operand.hbm [shape: f32[2,128,128], index: 7, kind: output, shape index: {}]  }
   0x1   :  { %2696 = sst [smem:[#allocation15_spill]] %s2689_s1 }
   0x2   :  { %12 = vsyncpa [#allocation3], 0 }
   0x3   :  { %14 = vsyncpa [#allocation3 + $0x1], 0 }
   0x4   :  { %15 = vsyncpa [#allocation6], 0 }
   0x5   :  { %16 = vsyncpa [#allocation9], 0 }
   0x6   :  { %17 = vsyncpa [#allocation4], 0 }
   0x7   :  { %19 = vsyncpa [#allocation4 + $0x1], 0  ;;  %s2098_s24 = smov 0   ;;  %s2100_s25 = smov 0  }
   0x8   :  { %s2102_s26 = smov 0   ;;  %s2104_s27 = smov 0  }
   0x9 LB: > { %s2119_s28 = sadd.s32 4294967295, %s2047_s27   ;;  %s1511_s29 = sadd.s32 4294967294, %s2047_s27   ;;  %s2047_s27 = sphi %s2104_s27, %s2708_s27   ;;  %s2043_s26 = sphi %s2102_s26, %s2707_s26   ;;  %s2039_s25 = sphi %s2100_s25, %s2706_s25   ;;  %s2035_s24 = sphi %s2098_s24, %s2705_s24  }
   0xa   : > { %p45_p0 = scmp.ne.s32.totalorder %s2039_s25, %s2035_s24  ;;  %p46_p1 = scmp.eq.s32.totalorder %s2119_s28, 0 }
   0xb   : > { %p195_p2 = scmp.eq.s32.totalorder %s2119_s28, 1  ;;  %p201_p3 = scmp.eq.s32.totalorder %s1511_s29, 1 }
   0xc   : > { %p2128_p4 = por %p46_p1, %p45_p0  ;;  %p1512_p5 = scmp.ge.s32.totalorder %s2047_s27, 1 }
   0xd   : > { %p2133_p6 = por %p201_p3, %p45_p0  ;;  %p208_p7 = scmp.lt.s32.totalorder %s2047_s27, 3 }
   0xe   : > { %s2699_s1 = sld [smem:[#allocation15_spill]]  ;;  %s2049_s13 = smov [#allocation5]  }
   0xf   : > { %p2141_p8 = pnand %p1512_p5, %p208_p7  ;;  %s221_s14 = sshll.u32 %s2049_s13, 4  ;;  %s222_s14 = int_to_ptr.vmem [resolvable:$true] %s221_s14 }
  0x10   : > { %s236_s18 = sshll.u32 %s2691_s3, 4  ;;  %s2050_s19 = smov 64   ;;  %s237_s18 = int_to_ptr.hbm [resolvable:$true] %s236_s18 }
  0x11   : > { %p1773_p9 = pneg %p2141_p8  ;;  %s2051_s20 = smov 4  }
  0x12   : > { %s2052_s21 = smov [#allocation7]   ;;  %s253_s9 = sshll.u32 %s2693_s5, 4  ;;  %s254_s9 = int_to_ptr.hbm [resolvable:$true] %s253_s9 }
  0x13   : > { %p2149_p10 = pnand %p1773_p9, %p46_p1  ;;  %s238_s22 = sshll.u32 %s2052_s21, 4  ;;  %s239_s22 = int_to_ptr.vmem [resolvable:$true] %s238_s22 }
  0x14   : > { %s219_s11 = sshll.u32 %s2699_s1, 4  ;;  %s2053_s10 = smov [#allocation8]   ;;  %s220_s11 = int_to_ptr.hbm [resolvable:$true] %s219_s11 }
  0x15   : > { %1776 = dma.hbm_to_vmem [thread:$0]  (!%p2149_p10), %s220_s11, 1024, %s222_s14, [#allocation6], %s2050_s19, %s2050_s19, %s2051_s20  }
  0x16   : > { %1779 = dma.hbm_to_vmem [thread:$0]  (!%p2149_p10), %s237_s18, 3072, %s239_s22, [#allocation6], %s2050_s19, %s2050_s19, %s2051_s20  }
  0x17   : > { %s255_s13 = sshll.u32 %s2053_s10, 4  ;;  %s2165_s11 = sadd.s32 1, %s2047_s27   ;;  %s256_s13 = int_to_ptr.vmem [resolvable:$true] %s255_s13 }
  0x18   : > { %1782 = dma.hbm_to_vmem [thread:$0]  (!%p2149_p10), %s254_s9, 1024, %s256_s13, [#allocation9], %s2050_s19, %s2050_s19, %s2051_s20  }
  0x19   : > { %s29_s14 = ssub.s32 %s2047_s27, %s2165_s11  ;;  %s32_s16 = sadd.s32 1, %s2043_s26 }
  0x1a   : > { %p30_p12 = scmp.eq.s32.totalorder %s29_s14, 0  ;;  %p39_p13 = scmp.ne.s32.totalorder %s2043_s26, %s2039_s25 }
  0x1b   : > { %p40_p0 = scmp.eq.s32.totalorder %s2047_s27, 0  ;;  %p1794_p3 = scmp.lt.s32.totalorder %s2047_s27, 2 }
  0x1c   : > { %s2177_s17 = scalar_select %p30_p12, %s2043_s26, %s32_s16  }
  0x1d   : > { %p41_p5 = por %p40_p0, %p39_p13  ;;  %p2181_p7 = por %p195_p2, %p39_p13 }
  0x1e   : > { %s272_s21 = sand.u32 1, %s2043_s26   ;;  %s1691_s22 = sshll.u32 %s2047_s27, 7 }
  0x1f   : > { %s1517_s15 = sshll.u32 %s272_s21, 7  ;;  %s281_s20 = scalar_lea.hbm %s2688_s0, %s1691_s22 }
  0x20   : > { %s282_s29 = sshll.u32 %s281_s20, 4  ;;  %s276_s9 = scalar_lea.vmem [#allocation2], %s1517_s15  ;;  %s283_s29 = int_to_ptr.hbm [resolvable:$true] %s282_s29 }
  0x21   : > { %s284_s10 = sshll.u32 %s276_s9, 4  ;;  %p2192_p9 = pnand %p1794_p3, %p41_p5  ;;  %s285_s10 = int_to_ptr.vmem [resolvable:$true] %s284_s10 }
  0x22   : > { %s273_s14 = scalar_lea.sflag [#allocation3], %s272_s21  ;;  %s1943_s16 = sshra.s32 %s283_s29, 4  ;;  %s1944_s16 = int_to_ptr.hbm [resolvable:$true] %s1943_s16 }
  0x23   : > { %s1945_s1 = scalar_lea.hbm %s1944_s16, 128  ;;  %p1947_p10 = pneg %p2192_p9 }
  0x24   : > { %p1946_p2 = scmp.ne.s32.totalorder %s1944_s16, %s1945_s1  ;;  %s1950_s23 = scalar_lea.hbm %s2688_s0, 256 }
  0x25   : > { %p1951_p0 = scmp.lt.s32.totalorder %s1944_s16, %s2688_s0  ;;  %p1952_p3 = scmp.lt.s32.totalorder %s1950_s23, %s1945_s1 }
  0x26   : > { %p1948_p12 = pnand %p1947_p10, %p1946_p2 }
  0x27   : > { %p1953_p5 = por %p1952_p3, %p1951_p0 }
  0x28   : > { %p1949_p13 = pneg %p1948_p12 }
  0x2a   : > { %p1954_p11 = pnand %p1953_p5, %p1949_p13 }
  0x2c   : > { %1957 = shalt.err (!%p1954_p11)
}
  0x2d   : > { %s2054_s21 = smov 128   ;;  %s2055_s9 = smov 8  }
  0x2e   : > { %1786 = dma.hbm_to_vmem [thread:$0]  (!%p2192_p9), %s283_s29, 2048, %s285_s10, %s273_s14, %s2054_s21, %s2054_s21, %s2055_s9  }
  0x2f   : > { %296 = sbr.rel (%p2141_p8) target bundleno = 662 (0x296), region = 48  ;;  %s2209_s22 = sand.u32 (!%p2141_p8), 1, %s2039_s25  }
  0x30   : > { %s1521_s16 = sshll.u32 (!%p2141_p8), %s2209_s22, 7  ;;  %s299_s1 = scalar_lea.sflag (!%p2141_p8), [#allocation3], %s2209_s22 }
  0x31   : > { %s2215_s15 = scalar_lea.vmem (!%p2141_p8), [#allocation2], %s1521_s16 }
  0x34   : > { %2018 = dma.done.wait (%p2128_p4), %s299_s1, 2048  }
  0x35   : > { %2020 = vsyncadd (%p2128_p4), %s299_s1, 4294965248 }
  0x36   : > { %2022 = dma.done.wait (%p46_p1), [#allocation6], 4096  }
  0x37   : > { %2024 = vsyncadd (%p46_p1), [#allocation6], 4294963200 }
  0x38   : > { %2026 = dma.done.wait (%p46_p1), [#allocation9], 1024  }
  0x39   : > { %2028 = vsyncadd (%p46_p1), [#allocation9], 4294966272  ;;  %v1699_v0 = vld [vmem:[#allocation5 + $0x38] sm:$0xff]  ;;  %v1698_v1 = vld [vmem:[#allocation5 + $0x30] sm:$0xff]  ;;  %s2606_s23 = scalar_lea.vmem [#allocation10], %s1521_s16  ;;  %s1732_s19 = sshll.u32 %s2119_s28, 7 }
  0x3a   : > { %441 = vmatpush.bf16.msra.mxu0 %v1699_v0  ;;  %1734 = vmatpush.bf16.msra.mxu2 %v1699_v0  ;;  %v1697_v2 = vld [vmem:[#allocation5 + $0x28] sm:$0xff]  ;;  %v1696_v3 = vld [vmem:[#allocation5 + $0x20] sm:$0xff]  ;;  %v1695_v4 = vld [vmem:[#allocation5 + $0x18] sm:$0xff]  ;;  %s1405_s9 = scalar_lea.hbm %s2695_s7, %s1732_s19  ;;  %s1406_s16 = sshll.u32 %s2606_s23, 4  ;;  %s1407_s16 = int_to_ptr.vmem [resolvable:$true] %s1406_s16 }
  0x3b   : > { %1735 = vmatpush.bf16.msra.mxu3 %v1699_v0  ;;  %1733 = vmatpush.bf16.msra.mxu1 %v1699_v0  ;;  %v1694_v5 = vld [vmem:[#allocation5 + $0x10] sm:$0xff]  ;;  %v1693_v6 = vld [vmem:[#allocation5 + $0x8] sm:$0xff]  ;;  %v1692_v7 = vld [vmem:[#allocation5] sm:$0xff]  ;;  %s1408_s1 = sshll.u32 %s1405_s9, 4  ;;  %s1394_s28 = scalar_lea.sflag [#allocation4], %s2209_s22  ;;  %s1409_s1 = int_to_ptr.hbm [resolvable:$true] %s1408_s1 }
  0x3c   : > { %v2230_v8 = vld [vmem:[%s2215_s15] sm:$0xff]  ;;  %v2233_v9 = vld [vmem:[%s2215_s15 + $0x8] sm:$0xff]  ;;  %v1715_v16 = vld [vmem:[#allocation7 + $0x78] sm:$0xff]  ;;  %s1987_s30 = sshra.s32 %s1409_s1, 4  ;;  %s1993_s13 = scalar_lea.hbm %s2695_s7, 256  ;;  %s1988_s30 = int_to_ptr.hbm [resolvable:$true] %s1987_s30 }
  0x3d   : > { %v357_v10 = vld [vmem:[%s2215_s15 + $0x40] sm:$0xff]  ;;  %v358_v11 = vld [vmem:[%s2215_s15 + $0x48] sm:$0xff]  ;;  %v1723_v17 = vld [vmem:[#allocation7 + $0xb8] sm:$0xff]  ;;  %v365_v18 = vpack.c.bf16 %v2233_v9, %v2230_v8  ;;  %s1989_s12 = scalar_lea.hbm %s1988_s30, 128  ;;  %p1994_p11 = scmp.lt.s32.totalorder %s1988_s30, %s2695_s7 }
  0x3e   : > { %442 = vmatpush.bf16.msra.mxu0 %v1698_v1  ;;  %1737 = vmatpush.bf16.msra.mxu2 %v1698_v1  ;;  %v361_v12 = vld [vmem:[%s2215_s15 + $0x60] sm:$0xff]  ;;  %v362_v13 = vld [vmem:[%s2215_s15 + $0x68] sm:$0xff]  ;;  %v369_v19 = vpack.c.bf16 %v358_v11, %v357_v10  ;;  %v1714_v22 = vld [vmem:[#allocation7 + $0x70] sm:$0xff]  ;;  %p1990_p1 = scmp.ne.s32.totalorder %s1988_s30, %s1989_s12  ;;  %p1995_p9 = scmp.lt.s32.totalorder %s1993_s13, %s1989_s12 }
  0x3f   : > { %1738 = vmatpush.bf16.msra.mxu3 %v1698_v1  ;;  %1736 = vmatpush.bf16.msra.mxu1 %v1698_v1  ;;  %v353_v14 = vld [vmem:[%s2215_s15 + $0x20] sm:$0xff]  ;;  %v354_v15 = vld [vmem:[%s2215_s15 + $0x28] sm:$0xff]  ;;  %v371_v20 = vpack.c.bf16 %v362_v13, %v361_v12  ;;  %v2244_v24 = vld [vmem:[%s2215_s15 + $0x10] sm:$0xff]  ;;  %v506_v1 = vlaneseq }
  0x40   : > { %v367_v21 = vpack.c.bf16 %v354_v15, %v353_v14  ;;  %v1713_v23 = vld [vmem:[#allocation7 + $0x68] sm:$0xff]  ;;  %v2247_v25 = vld [vmem:[%s2215_s15 + $0x18] sm:$0xff]  ;;  %v359_v26 = vld [vmem:[%s2215_s15 + $0x50] sm:$0xff]  ;;  %p1991_p4 = pnand %p1990_p1, %p2181_p7  ;;  %p1996_p2 = por %p1995_p9, %p1994_p11 }
  0x41   : > { %v360_v27 = vld [vmem:[%s2215_s15 + $0x58] sm:$0xff]  ;;  %v363_v28 = vld [vmem:[%s2215_s15 + $0x70] sm:$0xff]  ;;  %v366_v32 = vpack.c.bf16 %v2247_v25, %v2244_v24  ;;  %v1712_v36 = vld [vmem:[#allocation7 + $0x60] sm:$0xff] }
  0x42   : > { %443 = vmatpush.bf16.msra.mxu0 %v1697_v2  ;;  %1740 = vmatpush.bf16.msra.mxu2 %v1697_v2  ;;  %v364_v29 = vld [vmem:[%s2215_s15 + $0x78] sm:$0xff]  ;;  %v2254_v30 = vld [vmem:[%s2215_s15 + $0x30] sm:$0xff]  ;;  %v370_v33 = vpack.c.bf16 %v360_v27, %v359_v26  ;;  %v1721_v39 = vld [vmem:[#allocation7 + $0xa8] sm:$0xff]  ;;  %p1992_p8 = pneg %p1991_p4 }
  0x43   : > { %1741 = vmatpush.bf16.msra.mxu3 %v1697_v2  ;;  %1739 = vmatpush.bf16.msra.mxu1 %v1697_v2  ;;  %v2257_v31 = vld [vmem:[%s2215_s15 + $0x38] sm:$0xff]  ;;  %v372_v34 = vpack.c.bf16 %v364_v29, %v363_v28  ;;  %v1722_v37 = vld [vmem:[#allocation7 + $0xb0] sm:$0xff]  ;;  %v1720_v41 = vld [vmem:[#allocation7 + $0xa0] sm:$0xff] }
  0x44   : > { %v368_v35 = vpack.c.bf16 %v2257_v31, %v2254_v30  ;;  %v1711_v38 = vld [vmem:[#allocation7 + $0x58] sm:$0xff]  ;;  %v1710_v40 = vld [vmem:[#allocation7 + $0x50] sm:$0xff]  ;;  %v1709_v42 = vld [vmem:[#allocation7 + $0x48] sm:$0xff]  ;;  %p1997_p10 = pnand %p1996_p2, %p1992_p8 }
  0x45   : > { %v1707_v43 = vld [vmem:[#allocation7 + $0x38] sm:$0xff]  ;;  %v1708_v45 = vld [vmem:[#allocation7 + $0x40] sm:$0xff]  ;;  %v1706_v46 = vld [vmem:[#allocation7 + $0x30] sm:$0xff] }
  0x46   : > { %444 = vmatpush.bf16.msra.mxu0 %v1696_v3  ;;  %1743 = vmatpush.bf16.msra.mxu2 %v1696_v3  ;;  %v1719_v44 = vld [vmem:[#allocation7 + $0x98] sm:$0xff]  ;;  %v1718_v47 = vld [vmem:[#allocation7 + $0x90] sm:$0xff]  ;;  %v1705_v48 = vld [vmem:[#allocation7 + $0x28] sm:$0xff] }
  0x47   : > { %1744 = vmatpush.bf16.msra.mxu3 %v1696_v3  ;;  %1742 = vmatpush.bf16.msra.mxu1 %v1696_v3  ;;  %v1717_v49 = vld [vmem:[#allocation7 + $0x88] sm:$0xff]  ;;  %v1704_v50 = vld [vmem:[#allocation7 + $0x20] sm:$0xff]  ;;  %v1703_v52 = vld [vmem:[#allocation7 + $0x18] sm:$0xff] }
  0x48   : > { %v1716_v51 = vld [vmem:[#allocation7 + $0x80] sm:$0xff]  ;;  %v1702_v56 = vld [vmem:[#allocation7 + $0x10] sm:$0xff]  ;;  %v1701_v58 = vld [vmem:[#allocation7 + $0x8] sm:$0xff] }
  0x49   : > { %v2266_v53 = vld [vmem:[%s2690_s2] ss:$0 sm:$0xff] }
  0x4a   : > { %445 = vmatpush.bf16.msra.mxu0 %v1695_v4  ;;  %1746 = vmatpush.bf16.msra.mxu2 %v1695_v4  ;;  %v1700_v62 = vld [vmem:[#allocation7] sm:$0xff] }
  0x4b   : > { %1747 = vmatpush.bf16.msra.mxu3 %v1695_v4  ;;  %1745 = vmatpush.bf16.msra.mxu1 %v1695_v4 }
  0x4e   : > { %446 = vmatpush.bf16.msra.mxu0 %v1694_v5  ;;  %1749 = vmatpush.bf16.msra.mxu2 %v1694_v5 }
  0x4f   : > { %1750 = vmatpush.bf16.msra.mxu3 %v1694_v5  ;;  %1748 = vmatpush.bf16.msra.mxu1 %v1694_v5 }
  0x52   : > { %447 = vmatpush.bf16.msra.mxu0 %v1693_v6  ;;  %1752 = vmatpush.bf16.msra.mxu2 %v1693_v6 }
  0x53   : > { %1753 = vmatpush.bf16.msra.mxu3 %v1693_v6  ;;  %1751 = vmatpush.bf16.msra.mxu1 %v1693_v6  ;;  %v2277_v6 = vshrl.u32 %v506_v1, 7 }
  0x55   : > { %vm620_vm0 = vcmp.lt.s32.totalorder %v2277_v6, 7  ;;  %vm555_vm1 = vcmp.lt.s32.totalorder %v2277_v6, 1  ;;  %vm523_vm2 = vcmp.ge.s32.totalorder %v2277_v6, 1 }
  0x56   : > { %448 = vmatpush.bf16.msra.mxu0 %v1692_v7  ;;  %1755 = vmatpush.bf16.msra.mxu2 %v1692_v7 }
  0x57   : > { %1756 = vmatpush.bf16.msra.mxu3 %v1692_v7  ;;  %1754 = vmatpush.bf16.msra.mxu1 %v1692_v7 }
  0x59   : > { %449 = vmatmul.bf16.vlgmr.msra.gmra.mxu0 %v365_v18  ;;  %469 = vmatmul.bf16.vlgmr.msra.gmra.mxu2 %v369_v19 }
  0x5a   : > { %1090 = vmatpush.bf16.msrb.mxu2 %v1715_v16  ;;  %479 = vmatmul.bf16.vlgmr.msra.gmra.mxu3 %v371_v20 }
  0x5b   : > { %1139 = vmatpush.bf16.msrb.mxu3 %v1723_v17  ;;  %459 = vmatmul.bf16.vlgmr.msra.gmra.mxu1 %v367_v21 }
  0x5c   : > { %1041 = vmatpush.bf16.msrb.mxu1 %v1707_v43 }
  0x5e   : > { %1091 = vmatpush.bf16.msrb.mxu2 %v1714_v22 }
  0x5f   : > { %1140 = vmatpush.bf16.msrb.mxu3 %v1722_v37 }
  0x60   : > { %1042 = vmatpush.bf16.msrb.mxu1 %v1706_v46 }
  0x62   : > { %1092 = vmatpush.bf16.msrb.mxu2 %v1713_v23 }
  0x63   : > { %1141 = vmatpush.bf16.msrb.mxu3 %v1721_v39 }
  0x64   : > { %1043 = vmatpush.bf16.msrb.mxu1 %v1705_v48 }
  0x66   : > { %1093 = vmatpush.bf16.msrb.mxu2 %v1712_v36 }
  0x67   : > { %1142 = vmatpush.bf16.msrb.mxu3 %v1720_v41 }
  0x68   : > { %1044 = vmatpush.bf16.msrb.mxu1 %v1704_v50 }
  0x69   : > { %454 = vmatmul.bf16.gmra.mxu0 %v366_v32  ;;  %474 = vmatmul.bf16.gmra.mxu2 %v370_v33 }
  0x6a   : > { %484 = vmatmul.bf16.gmra.mxu3 %v372_v34  ;;  %1094 = vmatpush.bf16.msrb.mxu2 %v1711_v38 }
  0x6b   : > { %464 = vmatmul.bf16.gmra.mxu1 %v368_v35  ;;  %1143 = vmatpush.bf16.msrb.mxu3 %v1719_v44 }
  0x6c   : > { %1045 = vmatpush.bf16.msrb.mxu1 %v1703_v52 }
  0x6e   : > { %1095 = vmatpush.bf16.msrb.mxu2 %v1710_v40 }
  0x6f   : > { %1144 = vmatpush.bf16.msrb.mxu3 %v1718_v47 }
  0x70   : > { %1046 = vmatpush.bf16.msrb.mxu1 %v1702_v56 }
  0x72   : > { %1096 = vmatpush.bf16.msrb.mxu2 %v1709_v42 }
  0x73   : > { %1145 = vmatpush.bf16.msrb.mxu3 %v1717_v49 }
  0x74   : > { %1047 = vmatpush.bf16.msrb.mxu1 %v1701_v58 }
  0x76   : > { %1097 = vmatpush.bf16.msrb.mxu2 %v1708_v45 }
  0x77   : > { %1146 = vmatpush.bf16.msrb.mxu3 %v1716_v51 }
  0x78   : > { %1048 = vmatpush.bf16.msrb.mxu1 %v1700_v62 }
  0xd6   : > { %v450_v54 = vpop.f32.mrf.mxu0 }
  0xd7   : > { %v451_v55 = vadd.f32 %v2266_v53, %v450_v54 }
  0xd8   : > { %v460_v57 = vpop.f32.mrf.mxu1 }
  0xd9   : > { %v2269_v59 = vmax.f32 %v451_v55, 0.0  ;;  %v461_v22 = vadd.f32 %v2266_v53, %v460_v57 }
  0xdb   : > { %v669_v2 = vpack.c.bf16 %v2269_v59, %v2269_v59  ;;  %v604_v12 = vrot.slane %v2269_v59, 1  ;;  %v2300_v35 = vmax.f32 %v461_v22, 0.0  ;;  %v539_v40 = vrot.slane %v2269_v59, 7 }
  0xdc   : > { %v470_v60 = vpop.f32.mrf.mxu2 }
  0xdd   : > { %v480_v61 = vpop.f32.mrf.mxu3  ;;  %v765_v10 = vunpack.c.l.b16 %v669_v2  ;;  %v471_v23 = vadd.f32 %v2266_v53, %v470_v60  ;;  %v608_v50 = vrot.slane %v2300_v35, 1 }
  0xde   : > { %v481_v63 = vadd.f32 %v2266_v53, %v480_v61  ;;  %v452_v0 = vpop.f32.mrf.mxu0 }
  0xdf   : > { %v453_v3 = vadd.f32 %v2266_v53, %v452_v0  ;;  %v2305_v41 = vmax.f32 %v471_v23, 0.0 }
  0xe0   : > { %v462_v5 = vpop.f32.mrf.mxu1  ;;  %v2310_v44 = vmax.f32 %v481_v63, 0.0  ;;  %v673_v63 = vpack.c.bf16 %v2300_v35, %v2300_v35 }
  0xe1   : > { %v2275_v4 = vmax.f32 %v453_v3, 0.0  ;;  %v463_v38 = vadd.f32 %v2266_v53, %v462_v5  ;;  %v612_v54 = vrot.slane %v2305_v41, 1 }
  0xe2   : > { %v551_v58 = vrot.slane %v2310_v44, 7  ;;  %v616_v5 = vrot.slane %v2310_v44, 1  ;;  %v681_v22 = vpack.c.bf16 %v2310_v44, %v2310_v44 }
  0xe3   : > { %v670_v7 = vpack.c.bf16 %v2275_v4, %v2275_v4  ;;  %v605_v13 = vrot.slane %v2275_v4, 1  ;;  %v540_v45 = vrot.slane %v2275_v4, 7  ;;  %v2319_v51 = vmax.f32 %v463_v38, 0.0 }
  0xe4   : > { %v472_v11 = vpop.f32.mrf.mxu2 }
  0xe5   : > { %v482_v14 = vpop.f32.mrf.mxu3  ;;  %v766_v15 = vunpack.c.l.b16 %v670_v7  ;;  %v635_v21 = vsel %vm620_vm0, %v604_v12, %v605_v13  ;;  %v609_v60 = vrot.slane %v2319_v51, 1  ;;  %v570_v62 = vsel %vm555_vm1, %v539_v40, %v540_v45 }
  0xe6   : > { %v2284_v16 = vadd.f32 %v2266_v53, %v482_v14  ;;  %v455_v17 = vpop.f32.mrf.mxu0  ;;  %v685_v28 = vpack.c.bf16 %v635_v21, %v635_v21  ;;  %v473_v7 = vadd.f32 %v2266_v53, %v472_v11 }
  0xe7   : > { %v456_v18 = vadd.f32 %v2266_v53, %v455_v17  ;;  %v781_v19 = vpack.c.b16 %v766_v15, %v765_v10  ;;  %v654_v15 = vpack.c.bf16 %v570_v62, %v570_v62  ;;  %v631_v11 = vsel %vm620_vm0, %v608_v50, %v609_v60 }
  0xe8   : > { %v465_v29 = vpop.f32.mrf.mxu1  ;;  %v813_v46 = vunpack.c.l.b16 %v685_v28  ;;  %v2355_v28 = vunpack.c.l.b16 %v673_v63 }
  0xe9   : > { %v2288_v20 = vmax.f32 %v456_v18, 0.0  ;;  %1098 = vmatmul.bf16.vlgmr.msrb.gmra.mxu2 %v781_v19  ;;  %v466_v34 = vadd.f32 %v2266_v53, %v465_v29 }
  0xeb   : > { %v606_v26 = vrot.slane %v2288_v20, 1  ;;  %v671_v43 = vpack.c.bf16 %v2288_v20, %v2288_v20  ;;  %v2315_v49 = vmax.f32 %v466_v34, 0.0  ;;  %v541_v19 = vrot.slane %v2288_v20, 7 }
  0xec   : > { %v475_v27 = vpop.f32.mrf.mxu2  ;;  %v2365_v34 = vmax.f32 %v2284_v16, 0.0 }
  0xed   : > { %v485_v32 = vpop.f32.mrf.mxu3  ;;  %v634_v33 = vsel %vm620_vm0, %v605_v13, %v606_v26  ;;  %v767_v57 = vunpack.c.l.b16 %v671_v43  ;;  %v476_v0 = vadd.f32 %v2266_v53, %v475_v27  ;;  %v610_v4 = vrot.slane %v2315_v49, 1 }
  0xee   : > { %v486_v36 = vadd.f32 %v2266_v53, %v485_v32  ;;  %v457_v37 = vpop.f32.mrf.mxu0  ;;  %v686_v39 = vpack.c.bf16 %v634_v33, %v634_v33  ;;  %v674_v13 = vpack.c.bf16 %v2319_v51, %v2319_v51 }
  0xef   : > { %v458_v42 = vadd.f32 %v2266_v53, %v457_v37  ;;  %v2351_v23 = vmax.f32 %v476_v0, 0.0  ;;  %v630_v20 = vsel %vm620_vm0, %v609_v60, %v610_v4  ;;  %v718_v37 = vunpack.c.l.b16 %v654_v15 }
  0xf0   : > { %v814_v47 = vunpack.c.l.b16 %v686_v39  ;;  %v770_v38 = vunpack.c.l.b16 %v674_v13  ;;  %v689_v39 = vpack.c.bf16 %v631_v11, %v631_v11  ;;  %v467_v43 = vpop.f32.mrf.mxu1 }
  0xf1   : > { %v2313_v48 = vmax.f32 %v458_v42, 0.0  ;;  %v2367_v42 = vmax.f32 %v486_v36, 0.0  ;;  %v468_v62 = vadd.f32 %v2266_v53, %v467_v43  ;;  %v2418_v43 = vunpack.c.l.b16 %v681_v22 }
  0xf2   : > { %v829_v52 = vpack.c.b16 %v814_v47, %v813_v46  ;;  %v2375_v47 = vsel %vm555_vm1, %v540_v45, %v541_v19  ;;  %v617_v45 = vrot.slane %v2365_v34, 1  ;;  %v783_v63 = vpack.c.b16 %v770_v38, %v2355_v28 }
  0xf3   : > { %v607_v55 = vrot.slane %v2313_v48, 1  ;;  %v672_v56 = vpack.c.bf16 %v2313_v48, %v2313_v48  ;;  %v542_v16 = vrot.slane %v2313_v48, 7  ;;  %v618_v0 = vrot.slane %v2367_v42, 1 }
  0xf4   : > { %v477_v61 = vpop.f32.mrf.mxu2  ;;  %1147 = vmatmul.bf16.vlgmr.msrb.gmra.mxu3 %v829_v52  ;;  %v614_v52 = vrot.slane %v2351_v23, 1  ;;  %v2405_v11 = vmax.f32 %v468_v62, 0.0  ;;  %v683_v62 = vpack.c.bf16 %v2367_v42, %v2367_v42  ;;  %v677_v48 = vpack.c.bf16 %v2305_v41, %v2305_v41 }
  0xf5   : > { %v478_v1 = vadd.f32 %v2266_v53, %v477_v61  ;;  %v487_v2 = vpop.f32.mrf.mxu3  ;;  %v768_v3 = vunpack.c.l.b16 %v672_v56  ;;  %v632_v17 = vsel %vm620_vm0, %v607_v55, %v608_v50  ;;  %v633_v18 = vsel %vm620_vm0, %v606_v26, %v607_v55 }
  0xf6   : > { %v488_v10 = vadd.f32 %v2266_v53, %v487_v2  ;;  %v2361_v26 = vmax.f32 %v473_v7, 0.0  ;;  %v687_v32 = vpack.c.bf16 %v633_v18, %v633_v18  ;;  %v688_v33 = vpack.c.bf16 %v632_v17, %v632_v17 }
  0xf7   : > { %v782_v14 = vpack.c.b16 %v768_v3, %v767_v57  ;;  %v2353_v27 = vmax.f32 %v478_v1, 0.0  ;;  %v690_v50 = vpack.c.bf16 %v630_v20, %v630_v20  ;;  %v655_v2 = vpack.c.bf16 %v2375_v47, %v2375_v47 }
  0xf8   : > { %v2345_v21 = vmax.f32 %v488_v10, 0.0  ;;  %v613_v56 = vrot.slane %v2361_v26, 1  ;;  %v815_v60 = vunpack.c.l.b16 %v687_v32  ;;  %v816_v61 = vunpack.c.l.b16 %v688_v33 }
  0xf9   : > { %1103 = vmatmul.bf16.gmra.mxu2 %v782_v14  ;;  %v615_v55 = vrot.slane %v2353_v27, 1  ;;  %v2390_v3 = vunpack.c.l.b16 %v689_v39  ;;  %v568_v7 = vsel %vm555_vm1, %v541_v19, %v542_v16  ;;  %v2396_v10 = vunpack.c.l.b16 %v690_v50 }
  0xfa   : > { %v554_v29 = vrot.slane %v2345_v21, 7  ;;  %v553_v14 = vrot.slane %v2367_v42, 7  ;;  %v830_v17 = vpack.c.b16 %v816_v61, %v815_v60  ;;  %v675_v19 = vpack.c.bf16 %v2315_v49, %v2315_v49 }
  0xfb   : > { %v624_v53 = vsel %vm620_vm0, %v615_v55, %v616_v5  ;;  %v625_v13 = vsel %vm620_vm0, %v614_v52, %v615_v55  ;;  %v682_v20 = vpack.c.bf16 %v2365_v34, %v2365_v34  ;;  %v550_v32 = vrot.slane %v2353_v27, 7 }
  0xfc   : > { %v571_v46 = vsel %vm555_vm1, %v554_v29, %v539_v40  ;;  %v552_v40 = vrot.slane %v2365_v34, 7  ;;  %v695_v18 = vpack.c.bf16 %v625_v13, %v625_v13  ;;  %v696_v28 = vpack.c.bf16 %v624_v53, %v624_v53 }
  0xfd   : > { %v572_v36 = vsel %vm523_vm2, %v571_v46, 0.0  ;;  %v656_v33 = vpack.c.bf16 %v568_v7, %v568_v7  ;;  %v2420_v46 = vunpack.c.l.b16 %v682_v20  ;;  %v623_v50 = vsel %vm620_vm0, %v616_v5, %v617_v45 }
  0xfe   : > { %v653_v57 = vpack.c.bf16 %v572_v36, %v572_v36  ;;  %v2412_v38 = vunpack.c.l.b16 %v695_v18  ;;  %v2416_v39 = vunpack.c.l.b16 %v696_v28  ;;  %v619_v55 = vrot.slane %v2345_v21, 1 }
  0xff   : > { %v676_v36 = vpack.c.bf16 %v2405_v11, %v2405_v11  ;;  %v787_v22 = vpack.c.b16 %v2420_v46, %v2418_v43  ;;  %v720_v5 = vunpack.c.l.b16 %v656_v33  ;;  %v558_v53 = vsel %vm555_vm1, %v551_v58, %v552_v40  ;;  %v1726_v43 = vld [vmem:[#allocation8 + $0x10] sm:$0xff] }
 0x100   : > { %v717_v1 = vunpack.c.l.b16 %v653_v57  ;;  %v697_v57 = vpack.c.bf16 %v623_v50, %v623_v50  ;;  %v834_v61 = vpack.c.b16 %v2416_v39, %v2412_v38  ;;  %v2447_v13 = vunpack.c.l.b16 %v683_v62  ;;  %v1728_v38 = vld [vmem:[#allocation8 + $0x20] sm:$0xff]  ;;  %v1727_v39 = vld [vmem:[#allocation8 + $0x18] sm:$0xff] }
 0x101   : > { %v559_v42 = vsel %vm555_vm1, %v550_v32, %v551_v58  ;;  %v522_v20 = vadd.s32 120, %v2277_v6  ;;  %v626_v33 = vsel %vm620_vm0, %v613_v56, %v614_v52  ;;  %v627_v44 = vsel %vm620_vm0, %v612_v54, %v613_v56  ;;  %v1729_v6 = vld [vmem:[#allocation8 + $0x28] sm:$0xff] }
 0x102   : > { %v733_v15 = vpack.c.b16 %v718_v37, %v717_v1  ;;  %v622_v37 = vsel %vm620_vm0, %v617_v45, %v618_v0  ;;  %v684_v1 = vpack.c.bf16 %v2345_v21, %v2345_v21  ;;  %v2437_v45 = vunpack.c.l.b16 %v697_v57 }
 0x103   : > { %v698_v60 = vpack.c.bf16 %v622_v37, %v622_v37  ;;  %v665_v28 = vpack.c.bf16 %v559_v42, %v559_v42  ;;  %v693_v50 = vpack.c.bf16 %v627_v44, %v627_v44  ;;  %v694_v57 = vpack.c.bf16 %v626_v33, %v626_v33 }
 0x104   : > { %1049 = vmatmul.bf16.vlgmr.msrb.gmra.mxu1 %v733_v15  ;;  %1152 = vmatmul.bf16.gmra.mxu3 %v830_v17  ;;  %v2449_v15 = vunpack.c.l.b16 %v684_v1  ;;  %v666_v17 = vpack.c.bf16 %v558_v53, %v558_v53  ;;  %vm603_vm3 = vcmp.le.s32.totalorder %v522_v20, 126  ;;  %v636_v52 = vsel %vm620_vm0, %v619_v55, %v604_v12 }
 0x105   : > { %v2439_v7 = vunpack.c.l.b16 %v698_v60  ;;  %v2472_v60 = vunpack.c.l.b16 %v665_v28  ;;  %v556_v56 = vsel %vm555_vm1, %v553_v14, %v554_v29  ;;  %v557_v62 = vsel %vm555_vm1, %v552_v40, %v553_v14 }
 0x106   : > { %v788_v58 = vpack.c.b16 %v2449_v15, %v2447_v13  ;;  %v2470_v37 = vunpack.c.l.b16 %v666_v17  ;;  %v2486_v1 = vunpack.c.l.b16 %v693_v50  ;;  %v2488_v53 = vunpack.c.l.b16 %v694_v57 }
 0x107   : > { %v835_v18 = vpack.c.b16 %v2439_v7, %v2437_v45  ;;  %v652_v42 = vsel %vm603_vm3, %v636_v52, 0.0  ;;  %v667_v21 = vpack.c.bf16 %v557_v62, %v557_v62  ;;  %v668_v17 = vpack.c.bf16 %v556_v56, %v556_v56 }
 0x108   : > { %v739_v59 = vpack.c.b16 %v2470_v37, %v2472_v60  ;;  %v700_v12 = vpack.c.bf16 %v652_v42, %v652_v42  ;;  %v719_v29 = vunpack.c.l.b16 %v655_v2  ;;  %v771_v34 = vunpack.c.l.b16 %v675_v19 }
 0x109   : > { %1108 = vmatmul.bf16.gmra.mxu2 %v783_v63  ;;  %v621_v63 = vsel %vm620_vm0, %v618_v0, %v619_v55  ;;  %v833_v40 = vpack.c.b16 %v2488_v53, %v2486_v1  ;;  %v772_v14 = vunpack.c.l.b16 %v676_v36  ;;  %v2501_v20 = vunpack.c.l.b16 %v667_v21 }
 0x10a   : > { %v699_v0 = vpack.c.bf16 %v621_v63, %v621_v63  ;;  %v2499_v28 = vunpack.c.l.b16 %v700_v12  ;;  %v2503_v63 = vunpack.c.l.b16 %v668_v17  ;;  %v543_v33 = vrot.slane %v2300_v35, 7 }
 0x10b   : > { %v734_v44 = vpack.c.b16 %v720_v5, %v719_v29  ;;  %v831_v50 = vpack.c.b16 %v2396_v10, %v2390_v3  ;;  %v544_v47 = vrot.slane %v2319_v51, 7  ;;  %v611_v2 = vrot.slane %v2405_v11, 1 }
 0x10c   : > { %v2492_v55 = vunpack.c.l.b16 %v699_v0  ;;  %v740_v36 = vpack.c.b16 %v2503_v63, %v2501_v20  ;;  %v784_v57 = vpack.c.b16 %v772_v14, %v771_v34  ;;  %v567_v3 = vsel %vm555_vm1, %v542_v16, %v543_v33 }
 0x10d   : > { %v566_v35 = vsel %vm555_vm1, %v543_v33, %v544_v47  ;;  %v628_v51 = vsel %vm620_vm0, %v611_v2, %v612_v54  ;;  %v629_v10 = vsel %vm620_vm0, %v610_v4, %v611_v2  ;;  %v657_v5 = vpack.c.bf16 %v567_v3, %v567_v3 }
 0x10e   : > { %v836_v19 = vpack.c.b16 %v2499_v28, %v2492_v55  ;;  %v658_v52 = vpack.c.bf16 %v566_v35, %v566_v35  ;;  %v691_v0 = vpack.c.bf16 %v629_v10, %v629_v10  ;;  %v692_v56 = vpack.c.bf16 %v628_v51, %v628_v51 }
 0x10f   : > { %v678_v16 = vpack.c.bf16 %v2361_v26, %v2361_v26  ;;  %v721_v62 = vunpack.c.l.b16 %v657_v5  ;;  %v773_v42 = vunpack.c.l.b16 %v677_v48  ;;  %v545_v4 = vrot.slane %v2315_v49, 7 }
 0x110   : > { %v722_v1 = vunpack.c.l.b16 %v658_v52  ;;  %v819_v53 = vunpack.c.l.b16 %v691_v0  ;;  %v820_v54 = vunpack.c.l.b16 %v692_v56  ;;  %v546_v29 = vrot.slane %v2405_v11, 7 }
 0x111   : > { %v774_v12 = vunpack.c.l.b16 %v678_v16  ;;  %v565_v33 = vsel %vm555_vm1, %v544_v47, %v545_v4  ;;  %v679_v2 = vpack.c.bf16 %v2351_v23, %v2351_v23  ;;  %v680_v49 = vpack.c.bf16 %v2353_v27, %v2353_v27  ;;  %v1731_v27 = vld [vmem:[#allocation8 + $0x38] sm:$0xff] }
 0x112   : > { %v735_v21 = vpack.c.b16 %v722_v1, %v721_v62  ;;  %v832_v17 = vpack.c.b16 %v820_v54, %v819_v53  ;;  %v564_v14 = vsel %vm555_vm1, %v545_v4, %v546_v29  ;;  %v547_v10 = vrot.slane %v2305_v41, 7  ;;  %1280 = vmatpush.bf16.msrb.mxu0 %v1731_v27 }
 0x113   : > { %v785_v34 = vpack.c.b16 %v774_v12, %v773_v42  ;;  %v775_v35 = vunpack.c.l.b16 %v679_v2  ;;  %v776_v3 = vunpack.c.l.b16 %v680_v49  ;;  %v548_v5 = vrot.slane %v2361_v26, 7 }
 0x114   : > { %1054 = vmatmul.bf16.gmra.mxu1 %v734_v44  ;;  %1157 = vmatmul.bf16.gmra.mxu3 %v831_v50  ;;  %v659_v44 = vpack.c.bf16 %v565_v33, %v565_v33  ;;  %v660_v50 = vpack.c.bf16 %v564_v14, %v564_v14  ;;  %v563_v0 = vsel %vm555_vm1, %v546_v29, %v547_v10  ;;  %v549_v53 = vrot.slane %v2351_v23, 7 }
 0x115   : > { %v786_v47 = vpack.c.b16 %v776_v3, %v775_v35  ;;  %v562_v52 = vsel %vm555_vm1, %v547_v10, %v548_v5  ;;  %v661_v56 = vpack.c.bf16 %v563_v0, %v563_v0 }
 0x116   : > { %v724_v11 = vunpack.c.l.b16 %v660_v50  ;;  %v662_v48 = vpack.c.bf16 %v562_v52, %v562_v52  ;;  %v560_v41 = vsel %vm555_vm1, %v549_v53, %v550_v32  ;;  %v561_v26 = vsel %vm555_vm1, %v548_v5, %v549_v53  ;;  %v1730_v32 = vld [vmem:[#allocation8 + $0x30] sm:$0xff] }
 0x117   : > { %v725_v16 = vunpack.c.l.b16 %v661_v56  ;;  %v664_v54 = vpack.c.bf16 %v560_v41, %v560_v41  ;;  %1281 = vmatpush.bf16.msrb.mxu0 %v1730_v32 }
 0x118   : > { %v726_v62 = vunpack.c.l.b16 %v662_v48 }
 0x119   : > { %1113 = vmatmul.bf16.gmra.mxu2 %v784_v57  ;;  %v723_v57 = vunpack.c.l.b16 %v659_v44  ;;  %v728_v42 = vunpack.c.l.b16 %v664_v54 }
 0x11a   : > { %v737_v1 = vpack.c.b16 %v726_v62, %v725_v16 }
 0x11b   : > { %v736_v51 = vpack.c.b16 %v724_v11, %v723_v57  ;;  %1282 = vmatpush.bf16.msrb.mxu0 %v1729_v6 }
 0x11f   : > { %1283 = vmatpush.bf16.msrb.mxu0 %v1728_v38 }
 0x123   : > { %1284 = vmatpush.bf16.msrb.mxu0 %v1727_v39 }
 0x124   : > { %1059 = vmatmul.bf16.gmra.mxu1 %v735_v21  ;;  %1162 = vmatmul.bf16.gmra.mxu3 %v832_v17 }
 0x127   : > { %1285 = vmatpush.bf16.msrb.mxu0 %v1726_v43 }
 0x129   : > { %1118 = vmatmul.bf16.gmra.mxu2 %v785_v34 }
 0x134   : > { %1064 = vmatmul.bf16.gmra.mxu1 %v736_v51  ;;  %1167 = vmatmul.bf16.gmra.mxu3 %v833_v40  ;;  %v663_v40 = vpack.c.bf16 %v561_v26, %v561_v26 }
 0x136   : > { %v727_v23 = vunpack.c.l.b16 %v663_v40 }
 0x138   : > { %v738_v12 = vpack.c.b16 %v728_v42, %v727_v23 }
 0x139   : > { %1123 = vmatmul.bf16.gmra.mxu2 %v786_v47 }
 0x144   : > { %1069 = vmatmul.bf16.gmra.mxu1 %v737_v1  ;;  %1172 = vmatmul.bf16.gmra.mxu3 %v834_v61  ;;  %v1725_v61 = vld [vmem:[#allocation8 + $0x8] sm:$0xff] }
 0x145   : > { %1286 = vmatpush.bf16.msrb.mxu0 %v1725_v61 }
 0x149   : > { %1128 = vmatmul.bf16.gmra.mxu2 %v787_v22  ;;  %v1724_v22 = vld [vmem:[#allocation8] sm:$0xff] }
 0x14a   : > { %1287 = vmatpush.bf16.msrb.mxu0 %v1724_v22 }
 0x154   : > { %1074 = vmatmul.bf16.gmra.mxu1 %v738_v12  ;;  %1177 = vmatmul.bf16.gmra.mxu3 %v835_v18  ;;  %v2579_v18 = vld [vmem:[%s2692_s4] ss:$0 sm:$0xff] }
 0x159   : > { %1133 = vmatmul.bf16.gmra.mxu2 %v788_v58 }
 0x164   : > { %1079 = vmatmul.bf16.gmra.mxu1 %v739_v59  ;;  %1182 = vmatmul.bf16.gmra.mxu3 %v836_v19 }
 0x16c   : > { %v1099_v46 = vpop.f32.mrf.mxu2 }
 0x174   : > { %1084 = vmatmul.bf16.gmra.mxu1 %v740_v36  ;;  %v1101_v45 = vpop.f32.mrf.mxu2 }
 0x177   : > { %v1148_v7 = vpop.f32.mrf.mxu3 }
 0x17c   : > { %v1104_v13 = vpop.f32.mrf.mxu2 }
 0x17f   : > { %v1150_v15 = vpop.f32.mrf.mxu3 }
 0x181   : > { %v1050_v58 = vpop.f32.mrf.mxu1 }
 0x182   : > { %v1051_v37 = vadd.f32 %v2579_v18, %v1050_v58 }
 0x184   : > { %v1106_v60 = vpop.f32.mrf.mxu2  ;;  %v1100_v55 = vadd.f32 %v1099_v46, %v1051_v37 }
 0x186   : > { %v1149_v63 = vadd.f32 %v1148_v7, %v1100_v55 }
 0x187   : > { %v1153_v59 = vpop.f32.mrf.mxu3 }
 0x188   : > { %v1188_v4 = vmax.f32 %v1149_v63, 0.0 }
 0x189   : > { %v1052_v28 = vpop.f32.mrf.mxu1 }
 0x18a   : > { %v1053_v20 = vadd.f32 %v2579_v18, %v1052_v28 }
 0x18c   : > { %v1102_v19 = vadd.f32 %v1101_v45, %v1053_v20  ;;  %v1109_v36 = vpop.f32.mrf.mxu2 }
 0x18e   : > { %v1151_v21 = vadd.f32 %v1150_v15, %v1102_v19 }
 0x18f   : > { %v1155_v17 = vpop.f32.mrf.mxu3 }
 0x190   : > { %v1189_v29 = vmax.f32 %v1151_v21, 0.0 }
 0x191   : > { %v1055_v34 = vpop.f32.mrf.mxu1 }
 0x192   : > { %v1204_v14 = vpack.c.bf16 %v1189_v29, %v1188_v4  ;;  %v1056_v33 = vadd.f32 %v2579_v18, %v1055_v34 }
 0x194   : > { %1288 = vmatmul.bf16.vlgmr.msrb.gmra.mxu0 %v1204_v14  ;;  %v1111_v44 = vpop.f32.mrf.mxu2  ;;  %v1105_v2 = vadd.f32 %v1104_v13, %v1056_v33 }
 0x196   : > { %v1154_v35 = vadd.f32 %v1153_v59, %v1105_v2 }
 0x197   : > { %v1158_v50 = vpop.f32.mrf.mxu3 }
 0x198   : > { %v1190_v10 = vmax.f32 %v1154_v35, 0.0 }
 0x199   : > { %v1057_v49 = vpop.f32.mrf.mxu1 }
 0x19a   : > { %v1058_v57 = vadd.f32 %v2579_v18, %v1057_v49 }
 0x19c   : > { %v1107_v11 = vadd.f32 %v1106_v60, %v1058_v57  ;;  %v1114_v47 = vpop.f32.mrf.mxu2 }
 0x19e   : > { %v1156_v3 = vadd.f32 %v1155_v17, %v1107_v11 }
 0x19f   : > { %v1160_v51 = vpop.f32.mrf.mxu3 }
 0x1a0   : > { %v1191_v5 = vmax.f32 %v1156_v3, 0.0 }
 0x1a1   : > { %v1060_v52 = vpop.f32.mrf.mxu1 }
 0x1a2   : > { %v1205_v0 = vpack.c.bf16 %v1191_v5, %v1190_v10  ;;  %v1061_v56 = vadd.f32 %v2579_v18, %v1060_v52 }
 0x1a4   : > { %1293 = vmatmul.bf16.gmra.mxu0 %v1205_v0  ;;  %v1110_v16 = vadd.f32 %v1109_v36, %v1061_v56  ;;  %v1116_v53 = vpop.f32.mrf.mxu2 }
 0x1a6   : > { %v1159_v26 = vadd.f32 %v1158_v50, %v1110_v16 }
 0x1a7   : > { %v1163_v48 = vpop.f32.mrf.mxu3 }
 0x1a8   : > { %v1192_v23 = vmax.f32 %v1159_v26, 0.0 }
 0x1a9   : > { %v1062_v62 = vpop.f32.mrf.mxu1 }
 0x1aa   : > { %v1063_v1 = vadd.f32 %v2579_v18, %v1062_v62 }
 0x1ac   : > { %v1112_v41 = vadd.f32 %v1111_v44, %v1063_v1  ;;  %v1119_v6 = vpop.f32.mrf.mxu2 }
 0x1ae   : > { %v1161_v40 = vadd.f32 %v1160_v51, %v1112_v41 }
 0x1af   : > { %v1165_v54 = vpop.f32.mrf.mxu3 }
 0x1b0   : > { %v1193_v42 = vmax.f32 %v1161_v40, 0.0 }
 0x1b1   : > { %v1065_v12 = vpop.f32.mrf.mxu1 }
 0x1b2   : > { %v1206_v27 = vpack.c.bf16 %v1193_v42, %v1192_v23  ;;  %v1066_v32 = vadd.f32 %v2579_v18, %v1065_v12 }
 0x1b4   : > { %1298 = vmatmul.bf16.gmra.mxu0 %v1206_v27  ;;  %v1115_v39 = vadd.f32 %v1114_v47, %v1066_v32  ;;  %v1121_v7 = vpop.f32.mrf.mxu2 }
 0x1b6   : > { %v1164_v22 = vadd.f32 %v1163_v48, %v1115_v39 }
 0x1b7   : > { %v1168_v38 = vpop.f32.mrf.mxu3 }
 0x1b8   : > { %v1194_v13 = vmax.f32 %v1164_v22, 0.0 }
 0x1b9   : > { %v1067_v43 = vpop.f32.mrf.mxu1 }
 0x1ba   : > { %v1068_v46 = vadd.f32 %v2579_v18, %v1067_v43 }
 0x1bc   : > { %v1117_v61 = vadd.f32 %v1116_v53, %v1068_v46  ;;  %v1124_v28 = vpop.f32.mrf.mxu2 }
 0x1be   : > { %v1166_v45 = vadd.f32 %v1165_v54, %v1117_v61 }
 0x1bf   : > { %v1170_v58 = vpop.f32.mrf.mxu3 }
 0x1c0   : > { %v1195_v15 = vmax.f32 %v1166_v45, 0.0 }
 0x1c1   : > { %v1070_v37 = vpop.f32.mrf.mxu1 }
 0x1c2   : > { %v1207_v60 = vpack.c.bf16 %v1195_v15, %v1194_v13  ;;  %v1071_v59 = vadd.f32 %v2579_v18, %v1070_v37  ;;  %v2600_v37 = vld [vmem:[%s2694_s6] ss:$0 sm:$0xff] }
 0x1c4   : > { %1303 = vmatmul.bf16.gmra.mxu0 %v1207_v60  ;;  %v1120_v55 = vadd.f32 %v1119_v6, %v1071_v59  ;;  %v1126_v33 = vpop.f32.mrf.mxu2 }
 0x1c6   : > { %v1169_v21 = vadd.f32 %v1168_v38, %v1120_v55 }
 0x1c7   : > { %v1173_v19 = vpop.f32.mrf.mxu3 }
 0x1c8   : > { %v1196_v4 = vmax.f32 %v1169_v21, 0.0 }
 0x1c9   : > { %v1072_v20 = vpop.f32.mrf.mxu1 }
 0x1ca   : > { %v1073_v63 = vadd.f32 %v2579_v18, %v1072_v20 }
 0x1cc   : > { %v1122_v36 = vadd.f32 %v1121_v7, %v1073_v63  ;;  %v1129_v3 = vpop.f32.mrf.mxu2 }
 0x1ce   : > { %v1171_v17 = vadd.f32 %v1170_v58, %v1122_v36 }
 0x1cf   : > { %v1175_v50 = vpop.f32.mrf.mxu3 }
 0x1d0   : > { %v1197_v29 = vmax.f32 %v1171_v17, 0.0 }
 0x1d1   : > { %v1075_v34 = vpop.f32.mrf.mxu1 }
 0x1d2   : > { %v1208_v14 = vpack.c.bf16 %v1197_v29, %v1196_v4  ;;  %v1076_v44 = vadd.f32 %v2579_v18, %v1075_v34 }
 0x1d4   : > { %1308 = vmatmul.bf16.gmra.mxu0 %v1208_v14  ;;  %v1125_v2 = vadd.f32 %v1124_v28, %v1076_v44  ;;  %v1131_v48 = vpop.f32.mrf.mxu2 }
 0x1d6   : > { %v1174_v35 = vadd.f32 %v1173_v19, %v1125_v2 }
 0x1d7   : > { %v1178_v10 = vpop.f32.mrf.mxu3 }
 0x1d8   : > { %v1198_v5 = vmax.f32 %v1174_v35, 0.0 }
 0x1d9   : > { %v1077_v49 = vpop.f32.mrf.mxu1 }
 0x1da   : > { %v1078_v57 = vadd.f32 %v2579_v18, %v1077_v49 }
 0x1dc   : > { %v1127_v11 = vadd.f32 %v1126_v33, %v1078_v57  ;;  %v1134_v42 = vpop.f32.mrf.mxu2 }
 0x1de   : > { %v1176_v51 = vadd.f32 %v1175_v50, %v1127_v11  ;;  %v1843_v11 = vld [vmem:[%s2215_s15 + $0x20] sm:$0xff] }
 0x1df   : > { %v1180_v62 = vpop.f32.mrf.mxu3 }
 0x1e0   : > { %v1199_v47 = vmax.f32 %v1176_v51, 0.0 }
 0x1e1   : > { %v1080_v52 = vpop.f32.mrf.mxu1 }
 0x1e2   : > { %v1209_v0 = vpack.c.bf16 %v1199_v47, %v1198_v5  ;;  %v1081_v56 = vadd.f32 %v2579_v18, %v1080_v52  ;;  %v1844_v5 = vld [vmem:[%s2215_s15 + $0x28] sm:$0xff] }
 0x1e4   : > { %1313 = vmatmul.bf16.gmra.mxu0 %v1209_v0  ;;  %v1130_v16 = vadd.f32 %v1129_v3, %v1081_v56  ;;  %v1136_v46 = vpop.f32.mrf.mxu2 }
 0x1e6   : > { %v1179_v26 = vadd.f32 %v1178_v10, %v1130_v16 }
 0x1e7   : > { %v1183_v32 = vpop.f32.mrf.mxu3 }
 0x1e8   : > { %v1200_v54 = vmax.f32 %v1179_v26, 0.0 }
 0x1e9   : > { %v1082_v1 = vpop.f32.mrf.mxu1 }
 0x1ea   : > { %v1083_v53 = vadd.f32 %v2579_v18, %v1082_v1 }
 0x1ec   : > { %v1132_v41 = vadd.f32 %v1131_v48, %v1083_v53 }
 0x1ee   : > { %v1181_v40 = vadd.f32 %v1180_v62, %v1132_v41 }
 0x1ef   : > { %v1185_v45 = vpop.f32.mrf.mxu3 }
 0x1f0   : > { %v1201_v23 = vmax.f32 %v1181_v40, 0.0 }
 0x1f1   : > { %v1085_v12 = vpop.f32.mrf.mxu1 }
 0x1f2   : > { %v1210_v27 = vpack.c.bf16 %v1201_v23, %v1200_v54  ;;  %v1086_v6 = vadd.f32 %v2579_v18, %v1085_v12 }
 0x1f4   : > { %1318 = vmatmul.bf16.gmra.mxu0 %v1210_v27  ;;  %v1135_v38 = vadd.f32 %v1134_v42, %v1086_v6  ;;  %v1845_v42 = vld [vmem:[%s2215_s15 + $0x40] sm:$0xff] }
 0x1f6   : > { %v1184_v22 = vadd.f32 %v1183_v32, %v1135_v38  ;;  %v1846_v38 = vld [vmem:[%s2215_s15 + $0x48] sm:$0xff] }
 0x1f8   : > { %v1202_v13 = vmax.f32 %v1184_v22, 0.0  ;;  %v1847_v22 = vld [vmem:[%s2215_s15 + $0x50] sm:$0xff] }
 0x1f9   : > { %v1087_v39 = vpop.f32.mrf.mxu1 }
 0x1fa   : > { %v1088_v43 = vadd.f32 %v2579_v18, %v1087_v39 }
 0x1fc   : > { %v1137_v61 = vadd.f32 %v1136_v46, %v1088_v43 }
 0x1fe   : > { %v1186_v7 = vadd.f32 %v1185_v45, %v1137_v61 }
 0x200   : > { %v1203_v15 = vmax.f32 %v1186_v7, 0.0 }
 0x202   : > { %v1211_v58 = vpack.c.bf16 %v1203_v15, %v1202_v13 }
 0x204   : > { %1323 = vmatmul.bf16.gmra.mxu0 %v1211_v58 }
 0x211   : > { %v1289_v60 = vpop.f32.mrf.mxu0 }
 0x212   : > { %v1290_v59 = vadd.f32 %v2600_v37, %v1289_v60  ;;  %v1848_v60 = vld [vmem:[%s2215_s15 + $0x58] sm:$0xff] }
 0x214   : > { %v1329_v55 = vmax.f32 %v1290_v59, 0.0 }
 0x216   : > { %v1345_v18 = vadd.f32 %v1329_v55, %v2230_v8 }
 0x218   : > { %v1361_v28 = vmax.f32 %v1345_v18, 0.0 }
 0x219   : > { %v1291_v20 = vpop.f32.mrf.mxu0 }
 0x21a   : > { %1377 = vst [vmem:[%s2606_s23] sm:$0xff] %v1361_v28  ;;  %v1292_v63 = vadd.f32 %v2600_v37, %v1291_v20 }
 0x21c   : > { %v1330_v19 = vmax.f32 %v1292_v63, 0.0  ;;  %v1849_v63 = vld [vmem:[%s2215_s15 + $0x60] sm:$0xff] }
 0x21e   : > { %v1346_v36 = vadd.f32 %v1330_v19, %v2233_v9 }
 0x220   : > { %v1362_v21 = vmax.f32 %v1346_v36, 0.0 }
 0x221   : > { %v1294_v17 = vpop.f32.mrf.mxu0 }
 0x222   : > { %1378 = vst [vmem:[%s2606_s23 + $0x8] sm:$0xff] %v1362_v21  ;;  %v1295_v8 = vadd.f32 %v2600_v37, %v1294_v17 }
 0x224   : > { %v1331_v4 = vmax.f32 %v1295_v8, 0.0 }
 0x226   : > { %v1347_v29 = vadd.f32 %v1331_v4, %v2244_v24  ;;  %v1850_v4 = vld [vmem:[%s2215_s15 + $0x68] sm:$0xff] }
 0x228   : > { %v1363_v34 = vmax.f32 %v1347_v29, 0.0 }
 0x229   : > { %v1296_v14 = vpop.f32.mrf.mxu0 }
 0x22a   : > { %1379 = vst [vmem:[%s2606_s23 + $0x10] sm:$0xff] %v1363_v34  ;;  %v1297_v33 = vadd.f32 %v2600_v37, %v1296_v14 }
 0x22c   : > { %v1332_v44 = vmax.f32 %v1297_v33, 0.0 }
 0x22e   : > { %v1348_v50 = vadd.f32 %v1332_v44, %v2247_v25 }
 0x230   : > { %v1364_v9 = vmax.f32 %v1348_v50, 0.0  ;;  %v1851_v50 = vld [vmem:[%s2215_s15 + $0x70] sm:$0xff] }
 0x231   : > { %v1299_v2 = vpop.f32.mrf.mxu0 }
 0x232   : > { %1380 = vst [vmem:[%s2606_s23 + $0x18] sm:$0xff] %v1364_v9  ;;  %v1300_v49 = vadd.f32 %v2600_v37, %v1299_v2 }
 0x234   : > { %v1333_v57 = vmax.f32 %v1300_v49, 0.0 }
 0x236   : > { %v1349_v35 = vadd.f32 %v1843_v11, %v1333_v57 }
 0x238   : > { %v1365_v24 = vmax.f32 %v1349_v35, 0.0  ;;  %v1852_v35 = vld [vmem:[%s2215_s15 + $0x78] sm:$0xff] }
 0x239   : > { %v1301_v3 = vpop.f32.mrf.mxu0 }
 0x23a   : > { %1381 = vst [vmem:[%s2606_s23 + $0x20] sm:$0xff] %v1365_v24  ;;  %v1302_v51 = vadd.f32 %v2600_v37, %v1301_v3 }
 0x23c   : > { %v1334_v10 = vmax.f32 %v1302_v51, 0.0 }
 0x23e   : > { %v1350_v47 = vadd.f32 %v1844_v5, %v1334_v10 }
 0x240   : > { %v1366_v25 = vmax.f32 %v1350_v47, 0.0 }
 0x241   : > { %v1304_v52 = vpop.f32.mrf.mxu0 }
 0x242   : > { %1382 = vst [vmem:[%s2606_s23 + $0x28] sm:$0xff] %v1366_v25  ;;  %v1305_v0 = vadd.f32 %v2600_v37, %v1304_v52 }
 0x244   : > { %v1335_v56 = vmax.f32 %v1305_v0, 0.0 }
 0x246   : > { %v1351_v48 = vadd.f32 %v1335_v56, %v2254_v30 }
 0x248   : > { %v1367_v16 = vmax.f32 %v1351_v48, 0.0 }
 0x249   : > { %v1306_v62 = vpop.f32.mrf.mxu0 }
 0x24a   : > { %1383 = vst [vmem:[%s2606_s23 + $0x30] sm:$0xff] %v1367_v16  ;;  %v1307_v1 = vadd.f32 %v2600_v37, %v1306_v62 }
 0x24c   : > { %v1336_v53 = vmax.f32 %v1307_v1, 0.0 }
 0x24e   : > { %v1352_v41 = vadd.f32 %v1336_v53, %v2257_v31 }
 0x250   : > { %v1368_v26 = vmax.f32 %v1352_v41, 0.0 }
 0x251   : > { %v1309_v40 = vpop.f32.mrf.mxu0 }
 0x252   : > { %1384 = vst [vmem:[%s2606_s23 + $0x38] sm:$0xff] %v1368_v26  ;;  %v1310_v54 = vadd.f32 %v2600_v37, %v1309_v40 }
 0x254   : > { %v1337_v23 = vmax.f32 %v1310_v54, 0.0 }
 0x256   : > { %v1353_v30 = vadd.f32 %v1845_v42, %v1337_v23 }
 0x258   : > { %v1369_v12 = vmax.f32 %v1353_v30, 0.0 }
 0x259   : > { %v1311_v27 = vpop.f32.mrf.mxu0 }
 0x25a   : > { %1385 = vst [vmem:[%s2606_s23 + $0x40] sm:$0xff] %v1369_v12  ;;  %v1312_v32 = vadd.f32 %v2600_v37, %v1311_v27 }
 0x25c   : > { %v1338_v6 = vmax.f32 %v1312_v32, 0.0 }
 0x25e   : > { %v1354_v31 = vadd.f32 %v1846_v38, %v1338_v6 }
 0x260   : > { %v1370_v39 = vmax.f32 %v1354_v31, 0.0 }
 0x261   : > { %v1314_v43 = vpop.f32.mrf.mxu0 }
 0x262   : > { %1386 = vst [vmem:[%s2606_s23 + $0x48] sm:$0xff] %v1370_v39  ;;  %v1315_v46 = vadd.f32 %v2600_v37, %v1314_v43 }
 0x264   : > { %v1339_v61 = vmax.f32 %v1315_v46, 0.0 }
 0x266   : > { %v1355_v45 = vadd.f32 %v1847_v22, %v1339_v61 }
 0x268   : > { %v1371_v7 = vmax.f32 %v1355_v45, 0.0 }
 0x269   : > { %v1316_v13 = vpop.f32.mrf.mxu0 }
 0x26a   : > { %1387 = vst [vmem:[%s2606_s23 + $0x50] sm:$0xff] %v1371_v7  ;;  %v1317_v15 = vadd.f32 %v2600_v37, %v1316_v13 }
 0x26c   : > { %v1340_v58 = vmax.f32 %v1317_v15, 0.0 }
 0x26e   : > { %v1356_v59 = vadd.f32 %v1848_v60, %v1340_v58 }
 0x270   : > { %v1372_v55 = vmax.f32 %v1356_v59, 0.0 }
 0x271   : > { %v1319_v18 = vpop.f32.mrf.mxu0 }
 0x272   : > { %1388 = vst [vmem:[%s2606_s23 + $0x58] sm:$0xff] %v1372_v55  ;;  %v1320_v28 = vadd.f32 %v2600_v37, %v1319_v18 }
 0x274   : > { %v1341_v20 = vmax.f32 %v1320_v28, 0.0 }
 0x276   : > { %v1357_v19 = vadd.f32 %v1849_v63, %v1341_v20 }
 0x278   : > { %v1373_v36 = vmax.f32 %v1357_v19, 0.0 }
 0x279   : > { %v1321_v21 = vpop.f32.mrf.mxu0 }
 0x27a   : > { %1389 = vst [vmem:[%s2606_s23 + $0x60] sm:$0xff] %v1373_v36  ;;  %v1322_v17 = vadd.f32 %v2600_v37, %v1321_v21 }
 0x27c   : > { %v1342_v8 = vmax.f32 %v1322_v17, 0.0 }
 0x27e   : > { %v1358_v29 = vadd.f32 %v1850_v4, %v1342_v8 }
 0x280   : > { %v1374_v34 = vmax.f32 %v1358_v29, 0.0 }
 0x281   : > { %v1324_v14 = vpop.f32.mrf.mxu0 }
 0x282   : > { %1390 = vst [vmem:[%s2606_s23 + $0x68] sm:$0xff] %v1374_v34  ;;  %v1325_v33 = vadd.f32 %v2600_v37, %v1324_v14 }
 0x284   : > { %v1343_v44 = vmax.f32 %v1325_v33, 0.0 }
 0x286   : > { %v1359_v9 = vadd.f32 %v1851_v50, %v1343_v44 }
 0x288   : > { %v1375_v2 = vmax.f32 %v1359_v9, 0.0 }
 0x289   : > { %v1326_v49 = vpop.f32.mrf.mxu0 }
 0x28a   : > { %1391 = vst [vmem:[%s2606_s23 + $0x70] sm:$0xff] %v1375_v2  ;;  %v1327_v57 = vadd.f32 %v2600_v37, %v1326_v49 }
 0x28c   : > { %v1344_v11 = vmax.f32 %v1327_v57, 0.0 }
 0x28e   : > { %v1360_v24 = vadd.f32 %v1852_v35, %v1344_v11 }
 0x290   : > { %v1376_v3 = vmax.f32 %v1360_v24, 0.0 }
 0x292   : > { %1392 = vst [vmem:[%s2606_s23 + $0x78] sm:$0xff] %v1376_v3 }
 0x293   : > { %2000 = shalt.err (!%p1997_p10)
}
 0x294   : > { %s2056_s22 = smov 128   ;;  %s2057_s15 = smov 8  }
 0x295   : > { %1771 = dma.vmem_to_hbm [thread:$0]  (%p2181_p7), %s1407_s16, 2048, %s1409_s1, %s1394_s28, %s2056_s22, %s2056_s22, %s2057_s15  }
 0x296 PF: > { %s1423_s23 = sand.u32 1, %s2035_s24   ;;  %p2704_p12 = scmp.ge.s32.totalorder %s2047_s27, 2 }
 0x297   : > { %s1424_s20 = scalar_lea.sflag [#allocation4], %s1423_s23 }
 0x298   : > { %p1788_p13 = pnand %p2704_p12, %p2133_p6 }
 0x29a   : > { %p1789_p0 = pneg %p1788_p13 }
 0x29c   : > { %2030 = dma.done.wait (%p1789_p0), %s1424_s20, 2048  }
 0x29d   : > { %2032 = vsyncadd (%p1789_p0), %s1424_s20, 4294965248  ;;  %p22_p3 = scmp.ge.s32.totalorder %s2165_s11, 4   ;;  %s2705_s24 = smov %s2039_s25 }
 0x29e   : > { %s2706_s25 = smov %s2043_s26  ;;  %s2707_s26 = smov %s2177_s17 }
 0x29f   : > { %s2708_s27 = smov %s2165_s11  ;;  %24 = sbr.rel (!%p22_p3) target bundleno = 9 (0x9), region = 105 }
 0x2a4   :  { %1430 = vsyncpa [#allocation3], 1 }
 0x2a5   :  { %1432 = vsyncpa [#allocation3 + $0x1], 1 }
 0x2a6   :  { %1433 = vsyncpa [#allocation6], 1 }
 0x2a7   :  { %1434 = vsyncpa [#allocation9], 1 }
 0x2a8   :  { %1435 = vsyncpa [#allocation4], 1 }
 0x2a9   :  { %1437 = vsyncpa [#allocation4 + $0x1], 1 }

</bundles_post_ra>
